<compile_context>
chip_gen: v6e
topology: v6e:2x2x1
jax: 0.10.0
libtpu: 0.0.40
codegen_flags: <defaults>
</compile_context>

<pallas_src>
import jax
import jax.numpy as jnp
from jax.experimental import pallas as pl
from jax.experimental.pallas import tpu as pltpu

EPS = 1e-5
_LANE = 128
_SUBLANE = 8
_TARGET_BLOCK_BYTES = 1 << 20    # aim for >= ~1 MiB of x per grid step
_MAX_BLOCK_BYTES = 2 << 20       # hard cap per x block (VMEM budget)
_VMEM_LIMIT = 32 * 1024 * 1024   # explicit scoped-VMEM limit, safe on v5e/v6e/v7x


def _stats_kernel(x_ref, sum_ref, sq_ref):
    """Per-lane partial sum / sum-of-squares for one (image-block, channel)."""
    m = pl.program_id(2)

    @pl.when(m == 0)
    def _init():
        sum_ref[...] = jnp.zeros_like(sum_ref)
        sq_ref[...] = jnp.zeros_like(sq_ref)

    x = x_ref[...].astype(jnp.float32)                     # (NB, TS, TL)
    # Reduce only the non-lane axes here (VPU adds); the cross-lane reduce is
    # deferred to the tiny JAX finalize.
    sum_ref[...] += jnp.sum(x, axis=(0, 1))[None, :]       # (1, TL)
    sq_ref[...] += jnp.sum(x * x, axis=(0, 1))[None, :]    # (1, TL)


def _apply_kernel(scale_ref, shift_ref, x_ref, o_ref):
    """y = x * scale_c + shift_c (normalization + affine pre-folded)."""
    c = pl.program_id(1)
    scale = scale_ref[c]                                   # f32 scalar from SMEM
    shift = shift_ref[c]
    x = x_ref[...].astype(jnp.float32)                     # (NB, TS, TL)
    o_ref[...] = (x * scale + shift).astype(o_ref.dtype)


def _choose_tiles(n, hw, itemsize):
    """Pick (NB, TS, TL): dense (8,128)-friendly blocks that divide the array
    exactly and move ~1-2 MiB of x per grid step."""
    if hw % _LANE == 0:
        tl = _LANE            # lane axis; each (n, c) block is contiguous in HBM
    else:
        tl = hw               # rare fallback: full-extent lane dim
    s = hw // tl
    row_bytes = tl * itemsize

    if s * row_bytes <= _MAX_BLOCK_BYTES:
        ts = s                # whole channel plane per block
    else:
        # largest multiple-of-8 divisor of s within the per-block budget
        ts = None
        cap = max(_SUBLANE, _MAX_BLOCK_BYTES // row_bytes)
        t = _SUBLANE
        while t <= min(s, cap):
            if s % t == 0:
                ts = t
            t += _SUBLANE
        if ts is None:
            ts = s            # no clean sub-tile; fall back to the full dim
    block_bytes = ts * row_bytes

    nb = 1
    if ts == s:
        # Whole channel plane fits in one block: batch images together until
        # each grid step moves ~_TARGET_BLOCK_BYTES (still under the hard cap).
        for d in range(1, n + 1):
            if n % d == 0 and d * block_bytes <= _MAX_BLOCK_BYTES:
                nb = d
                if d * block_bytes >= _TARGET_BLOCK_BYTES:
                    break
    return nb, ts, tl


def batchnorm2d(x, gamma, beta, eps=EPS):
    """x: (N, C, H, W); gamma, beta: (C,). Returns (N, C, H, W)."""
    N, C, H, W = x.shape
    HW = H * W
    NB, TS, TL = _choose_tiles(N, HW, jnp.dtype(x.dtype).itemsize)
    S = HW // TL
    n_blk = N // NB
    m_blk = S // TS

    # NCHW -> (N, C, S, TL): pure reshape of contiguous data, no HBM movement.
    x4 = x.reshape(N, C, S, TL)

    grid = (n_blk, C, m_blk)
    x_spec = pl.BlockSpec((NB, None, TS, TL), lambda n, c, m: (n, c, m, 0))

    # ---- Phase 1: per-(image-block, channel) per-lane partial statistics.
    part_spec = pl.BlockSpec((None, None, 1, TL), lambda n, c, m: (n, c, 0, 0))
    sums, sqs = pl.pallas_call(
        _stats_kernel,
        out_shape=(jax.ShapeDtypeStruct((n_blk, C, 1, TL), jnp.float32),
                   jax.ShapeDtypeStruct((n_blk, C, 1, TL), jnp.float32)),
        grid=grid,
        in_specs=[x_spec],
        out_specs=(part_spec, part_spec),
        compiler_params=pltpu.CompilerParams(
            dimension_semantics=("parallel", "parallel", "arbitrary"),
            vmem_limit_bytes=_VMEM_LIMIT),
    )(x4)

    # ---- Tiny finalize in plain JAX: combine partials (C*TL numbers) and fold
    # gamma/beta into per-channel scale/shift.  (E[x^2]-mean^2 in f32; the
    # clamp guards round-off for BN-scale inputs.)
    inv_count = 1.0 / float(N * HW)
    sum_c = jnp.sum(sums, axis=(0, 2, 3))                     # (C,)
    sq_c = jnp.sum(sqs, axis=(0, 2, 3))                       # (C,)
    mean = sum_c * inv_count
    var = jnp.maximum(sq_c * inv_count - mean * mean, 0.0)    # biased variance
    inv_std = jax.lax.rsqrt(var + eps)
    scale = gamma.astype(jnp.float32) * inv_std               # (C,)
    shift = beta.astype(jnp.float32) - mean * scale           # (C,)

    # ---- Phase 2: streaming y = x * scale_c + shift_c, fully parallel grid.
    smem_spec = pl.BlockSpec(memory_space=pltpu.MemorySpace.SMEM)
    y4 = pl.pallas_call(
        _apply_kernel,
        out_shape=jax.ShapeDtypeStruct((N, C, S, TL), x.dtype),
        grid=grid,
        in_specs=[smem_spec, smem_spec, x_spec],
        out_specs=x_spec,
        compiler_params=pltpu.CompilerParams(
            dimension_semantics=("parallel", "parallel", "parallel"),
            vmem_limit_bytes=_VMEM_LIMIT),
    )(scale, shift, x4)

    return y4.reshape(N, C, H, W)


if __name__ == "__main__":
    # BatchNorm(last=False) -> nn.BatchNorm2d(5)
    N, C, H, W = 2, 5, 16, 16
    key = jax.random.PRNGKey(0)
    x = jax.random.normal(key, (N, C, H, W), dtype=jnp.float32)

    # Deterministic parameters matching nn.BatchNorm2d defaults.
    gamma = jnp.ones((C,), dtype=jnp.float32)
    beta = jnp.zeros((C,), dtype=jnp.float32)

    y = jax.jit(batchnorm2d)(x, gamma, beta)
    jax.block_until_ready(y)

    # Reference: training-mode batch statistics (biased variance).
    mean = jnp.mean(x, axis=(0, 2, 3), keepdims=True)
    var = jnp.mean((x - mean) ** 2, axis=(0, 2, 3), keepdims=True)
    ref = (x - mean) / jnp.sqrt(var + EPS) * gamma.reshape(1, C, 1, 1) \
          + beta.reshape(1, C, 1, 1)
    assert y.shape == (N, C, H, W)
    assert jnp.max(jnp.abs(y - ref)) < 1e-4

    print("KERNEL_OK")
</pallas_src>

<mosaic_0001>
module attributes {stable_mosaic.version = 11 : i64} {
  func.func @_stats_kernel(%arg0: i32, %arg1: i32, %arg2: i32, %arg3: memref<2x1x2x128xf32, #tpu.memory_space<vmem>>, %arg4: memref<1x1x1x128xf32, #tpu.memory_space<vmem>>, %arg5: memref<1x1x1x128xf32, #tpu.memory_space<vmem>>) attributes {dimension_semantics = [#tpu.dimension_semantics<parallel>, #tpu.dimension_semantics<parallel>, #tpu.dimension_semantics<arbitrary>], iteration_bounds = array<i64: 1, 5, 1>, scalar_prefetch = 0 : i64, scratch_operands = 0 : i64, tpu.core_type = #tpu.core_type<tc>, window_params = [{transform_indices = @transform_0, window_bounds = array<i64: 2, 1, 2, 128>}, {transform_indices = @transform_1, window_bounds = array<i64: 1, 1, 1, 128>}, {transform_indices = @transform_2, window_bounds = array<i64: 1, 1, 1, 128>}]} {
    %c0_i32 = arith.constant 0 : i32
    %0 = arith.cmpi eq, %arg2, %c0_i32 : i32
    %1 = arith.extui %0 : i1 to i32
    %c0_i32_0 = arith.constant 0 : i32
    %2 = arith.cmpi ne, %1, %c0_i32_0 : i32
    scf.if %2 {
      %cst_21 = arith.constant 0.000000e+00 : f32
      %22 = vector.broadcast %cst_21 : f32 to vector<1x128xf32>
      %c0_22 = arith.constant 0 : index
      %c0_23 = arith.constant 0 : index
      %c0_24 = arith.constant 0 : index
      %c0_25 = arith.constant 0 : index
      %23 = vector.load %arg4[%c0_22, %c0_23, %c0_24, %c0_25] : memref<1x1x1x128xf32, #tpu.memory_space<vmem>>, vector<1x1x1x128xf32>
      %24 = vector.shape_cast %23 : vector<1x1x1x128xf32> to vector<1x128xf32>
      %25 = vector.shape_cast %22 : vector<1x128xf32> to vector<1x1x1x128xf32>
      tpu.vector_store %arg4[%c0_22, %c0_23, %c0_24, %c0_25], %25 {strides = array<i32>} : memref<1x1x1x128xf32, #tpu.memory_space<vmem>>, vector<1x1x1x128xf32>,
      %cst_26 = arith.constant 0.000000e+00 : f32
      %26 = vector.broadcast %cst_26 : f32 to vector<1x128xf32>
      %c0_27 = arith.constant 0 : index
      %c0_28 = arith.constant 0 : index
      %c0_29 = arith.constant 0 : index
      %c0_30 = arith.constant 0 : index
      %27 = vector.load %arg5[%c0_27, %c0_28, %c0_29, %c0_30] : memref<1x1x1x128xf32, #tpu.memory_space<vmem>>, vector<1x1x1x128xf32>
      %28 = vector.shape_cast %27 : vector<1x1x1x128xf32> to vector<1x128xf32>
      %29 = vector.shape_cast %26 : vector<1x128xf32> to vector<1x1x1x128xf32>
      tpu.vector_store %arg5[%c0_27, %c0_28, %c0_29, %c0_30], %29 {strides = array<i32>} : memref<1x1x1x128xf32, #tpu.memory_space<vmem>>, vector<1x1x1x128xf32>,
    } else {
    }
    %c0 = arith.constant 0 : index
    %c0_1 = arith.constant 0 : index
    %c0_2 = arith.constant 0 : index
    %c0_3 = arith.constant 0 : index
    %3 = vector.load %arg3[%c0, %c0_1, %c0_2, %c0_3] : memref<2x1x2x128xf32, #tpu.memory_space<vmem>>, vector<2x1x2x128xf32>
    %4 = vector.shape_cast %3 : vector<2x1x2x128xf32> to vector<2x2x128xf32>
    %c0_4 = arith.constant 0 : index
    %c0_5 = arith.constant 0 : index
    %c0_6 = arith.constant 0 : index
    %c0_7 = arith.constant 0 : index
    %5 = vector.load %arg4[%c0_4, %c0_5, %c0_6, %c0_7] : memref<1x1x1x128xf32, #tpu.memory_space<vmem>>, vector<1x1x1x128xf32>
    %6 = vector.shape_cast %5 : vector<1x1x1x128xf32> to vector<1x128xf32>
    %cst = arith.constant dense<0.000000e+00> : vector<128xf32>
    %7 = vector.multi_reduction <add>, %4, %cst [0, 1] : vector<2x2x128xf32> to vector<128xf32>
    %8 = vector.shape_cast %7 : vector<128xf32> to vector<1x128xf32>
    %9 = arith.addf %6, %8 : vector<1x128xf32>
    %c0_8 = arith.constant 0 : index
    %c0_9 = arith.constant 0 : index
    %c0_10 = arith.constant 0 : index
    %c0_11 = arith.constant 0 : index
    %10 = vector.load %arg4[%c0_8, %c0_9, %c0_10, %c0_11] : memref<1x1x1x128xf32, #tpu.memory_space<vmem>>, vector<1x1x1x128xf32>
    %11 = vector.shape_cast %10 : vector<1x1x1x128xf32> to vector<1x128xf32>
    %12 = vector.shape_cast %9 : vector<1x128xf32> to vector<1x1x1x128xf32>
    tpu.vector_store %arg4[%c0_8, %c0_9, %c0_10, %c0_11], %12 {strides = array<i32>} : memref<1x1x1x128xf32, #tpu.memory_space<vmem>>, vector<1x1x1x128xf32>,
    %c0_12 = arith.constant 0 : index
    %c0_13 = arith.constant 0 : index
    %c0_14 = arith.constant 0 : index
    %c0_15 = arith.constant 0 : index
    %13 = vector.load %arg5[%c0_12, %c0_13, %c0_14, %c0_15] : memref<1x1x1x128xf32, #tpu.memory_space<vmem>>, vector<1x1x1x128xf32>
    %14 = vector.shape_cast %13 : vector<1x1x1x128xf32> to vector<1x128xf32>
    %15 = arith.mulf %4, %4 : vector<2x2x128xf32>
    %cst_16 = arith.constant dense<0.000000e+00> : vector<128xf32>
    %16 = vector.multi_reduction <add>, %15, %cst_16 [0, 1] : vector<2x2x128xf32> to vector<128xf32>
    %17 = vector.shape_cast %16 : vector<128xf32> to vector<1x128xf32>
    %18 = arith.addf %14, %17 : vector<1x128xf32>
    %c0_17 = arith.constant 0 : index
    %c0_18 = arith.constant 0 : index
    %c0_19 = arith.constant 0 : index
    %c0_20 = arith.constant 0 : index
    %19 = vector.load %arg5[%c0_17, %c0_18, %c0_19, %c0_20] : memref<1x1x1x128xf32, #tpu.memory_space<vmem>>, vector<1x1x1x128xf32>
    %20 = vector.shape_cast %19 : vector<1x1x1x128xf32> to vector<1x128xf32>
    %21 = vector.shape_cast %18 : vector<1x128xf32> to vector<1x1x1x128xf32>
    tpu.vector_store %arg5[%c0_17, %c0_18, %c0_19, %c0_20], %21 {strides = array<i32>} : memref<1x1x1x128xf32, #tpu.memory_space<vmem>>, vector<1x1x1x128xf32>,
    return
  }
  func.func @transform_0(%arg0: i32, %arg1: i32, %arg2: i32) -> (i32, i32, i32, i32) {
    %c0_i32 = arith.constant 0 : i32
    %c0_i32_0 = arith.constant 0 : i32
    return %arg0, %arg1, %arg2, %c0_i32 : i32, i32, i32, i32
  }
  func.func @transform_1(%arg0: i32, %arg1: i32, %arg2: i32) -> (i32, i32, i32, i32) {
    %c0_i32 = arith.constant 0 : i32
    %c0_i32_0 = arith.constant 0 : i32
    %c0_i32_1 = arith.constant 0 : i32
    return %arg0, %arg1, %c0_i32, %c0_i32_0 : i32, i32, i32, i32
  }
  func.func @transform_2(%arg0: i32, %arg1: i32, %arg2: i32) -> (i32, i32, i32, i32) {
    %c0_i32 = arith.constant 0 : i32
    %c0_i32_0 = arith.constant 0 : i32
    %c0_i32_1 = arith.constant 0 : i32
    return %arg0, %arg1, %c0_i32, %c0_i32_0 : i32, i32, i32, i32
  }
}

module attributes {stable_mosaic.version = 11 : i64} {
  func.func @_apply_kernel(%arg0: i32, %arg1: i32, %arg2: i32, %arg3: memref<5xf32, #tpu.memory_space<smem>>, %arg4: memref<5xf32, #tpu.memory_space<smem>>, %arg5: memref<2x1x2x128xf32, #tpu.memory_space<vmem>>, %arg6: memref<2x1x2x128xf32, #tpu.memory_space<vmem>>) attributes {dimension_semantics = [#tpu.dimension_semantics<parallel>, #tpu.dimension_semantics<parallel>, #tpu.dimension_semantics<parallel>], iteration_bounds = array<i64: 1, 5, 1>, scalar_prefetch = 0 : i64, scratch_operands = 0 : i64, tpu.core_type = #tpu.core_type<tc>, window_params = [{transform_indices = @transform_0, window_bounds = array<i64: 5>}, {transform_indices = @transform_1, window_bounds = array<i64: 5>}, {transform_indices = @transform_2, window_bounds = array<i64: 2, 1, 2, 128>}, {transform_indices = @transform_3, window_bounds = array<i64: 2, 1, 2, 128>}]} {
    %0 = arith.index_cast %arg1 : i32 to index
    %1 = memref.load %arg3[%0] : memref<5xf32, #tpu.memory_space<smem>>
    %2 = arith.index_cast %arg1 : i32 to index
    %3 = memref.load %arg4[%2] : memref<5xf32, #tpu.memory_space<smem>>
    %c0 = arith.constant 0 : index
    %c0_0 = arith.constant 0 : index
    %c0_1 = arith.constant 0 : index
    %c0_2 = arith.constant 0 : index
    %4 = vector.load %arg5[%c0, %c0_0, %c0_1, %c0_2] : memref<2x1x2x128xf32, #tpu.memory_space<vmem>>, vector<2x1x2x128xf32>
    %5 = vector.shape_cast %4 : vector<2x1x2x128xf32> to vector<2x2x128xf32>
    %6 = vector.broadcast %1 : f32 to vector<2x2x128xf32>
    %7 = arith.mulf %5, %6 : vector<2x2x128xf32>
    %8 = vector.broadcast %3 : f32 to vector<2x2x128xf32>
    %9 = arith.addf %7, %8 : vector<2x2x128xf32>
    %c0_3 = arith.constant 0 : index
    %c0_4 = arith.constant 0 : index
    %c0_5 = arith.constant 0 : index
    %c0_6 = arith.constant 0 : index
    %10 = vector.load %arg6[%c0_3, %c0_4, %c0_5, %c0_6] : memref<2x1x2x128xf32, #tpu.memory_space<vmem>>, vector<2x1x2x128xf32>
    %11 = vector.shape_cast %10 : vector<2x1x2x128xf32> to vector<2x2x128xf32>
    %12 = vector.shape_cast %9 : vector<2x2x128xf32> to vector<2x1x2x128xf32>
    tpu.vector_store %arg6[%c0_3, %c0_4, %c0_5, %c0_6], %12 {strides = array<i32>} : memref<2x1x2x128xf32, #tpu.memory_space<vmem>>, vector<2x1x2x128xf32>,
    return
  }
  func.func @transform_0(%arg0: i32, %arg1: i32, %arg2: i32) -> i32 {
    %c0_i32 = arith.constant 0 : i32
    %c0_i32_0 = arith.constant 0 : i32
    return %c0_i32 : i32
  }
  func.func @transform_1(%arg0: i32, %arg1: i32, %arg2: i32) -> i32 {
    %c0_i32 = arith.constant 0 : i32
    %c0_i32_0 = arith.constant 0 : i32
    return %c0_i32 : i32
  }
  func.func @transform_2(%arg0: i32, %arg1: i32, %arg2: i32) -> (i32, i32, i32, i32) {
    %c0_i32 = arith.constant 0 : i32
    %c0_i32_0 = arith.constant 0 : i32
    return %arg0, %arg1, %arg2, %c0_i32 : i32, i32, i32, i32
  }
  func.func @transform_3(%arg0: i32, %arg1: i32, %arg2: i32) -> (i32, i32, i32, i32) {
    %c0_i32 = arith.constant 0 : i32
    %c0_i32_0 = arith.constant 0 : i32
    return %arg0, %arg1, %arg2, %c0_i32 : i32, i32, i32, i32
  }
}

</mosaic_0001>

<bundles_post_ra>
// kernel: batchnorm2d.3
= control target key start
LH: loop header
LB: loop body
LE: loop exit
PB: predicated region body
PF: predicated region fallthrough
CT: control target
= control target key end

     0   :  { %8 = vsyncpa [#allocation3], 0  ;;  %s718_s0 = inlined_call_operand.vmem [shape: f32[5], index: 0, kind: input, shape index: {}]   ;;  %s719_s1 = inlined_call_operand.vmem [shape: f32[5], index: 1, kind: input, shape index: {}]   ;;  %s720_s2 = inlined_call_operand.vmem [shape: f32[2,5,2,128], index: 2, kind: input, shape index: {}]   ;;  %s721_s3 = inlined_call_operand.vmem [shape: f32[2,5,2,128], index: 3, kind: output, shape index: {}]  }
   0x1   :  { %9 = vsyncpa [#allocation5], 0  ;;  %s600_s12 = smov 0   ;;  %s602_s13 = smov 0  }
   0x2   :  { %s604_s14 = smov 0   ;;  %s606_s15 = smov 0  }
   0x3   :  { %s608_s16 = smov 0  }
   0x4 LB: > { %s422_s17 = sadd.s32 4294967295, %s576_s16   ;;  %s30_s18 = sadd.s32 1, %s572_s15  ;;  %s576_s16 = sphi %s608_s16, %s15_s16   ;;  %s572_s15 = sphi %s606_s15, %s737_s15   ;;  %s568_s14 = sphi %s604_s14, %s736_s14   ;;  %s564_s13 = sphi %s602_s13, %s735_s13   ;;  %s560_s12 = sphi %s600_s12, %s734_s12  }
   0x5   : > { %p32_p0 = scmp.ge.s32.totalorder %s30_s18, 5  ;;  %s87_s19 = sadd.s32 1, %s564_s13 }
   0x6   : > { %p94_p1 = scmp.ne.s32.totalorder %s564_s13, %s560_s12  ;;  %p95_p2 = scmp.eq.s32.totalorder %s576_s16, 0 }
   0x7   : > { %s739_s18 = smov (%p32_p0, %s30_s18), 0  ;;  %p128_p4 = scmp.eq.s32.totalorder %s422_s17, 4 }
   0x8   : > { %p633_p3 = por %p95_p2, %p94_p1  ;;  %s81_s21 = ssub.s32 %s572_s15, %s739_s18 }
   0x9   : > { %p424_p5 = scmp.ge.s32.totalorder %s576_s16, 1  ;;  %p85_p6 = scmp.eq.s32.totalorder %s81_s21, 0 }
   0xa   : > { %s725_s20 = scalar_select %p633_p3, 1, 0 }
   0xb   : > { %p640_p7 = por %p128_p4, %p94_p1  ;;  %p141_p8 = scmp.lt.s32.totalorder %s576_s16, 6 }
   0xc   : > { %s646_s23 = scalar_select %p85_p6, %s564_s13, %s87_s19  }
   0xd   : > { %s726_s22 = scalar_select %p640_p7, 1, 0 }
   0xe   : > { %p648_p9 = pnand %p424_p5, %p141_p8  ;;  %p652_p10 = scmp.eq.s32.totalorder %s422_s17, 0 }
   0xf   : > { %s154_s28 = sshll.u32 %s718_s0, 4  ;;  %s165_s4 = sshll.u32 %s719_s1, 4  ;;  %s155_s28 = int_to_ptr.vmem [resolvable:$true] %s154_s28  ;;  %s166_s4 = int_to_ptr.vmem [resolvable:$true] %s165_s4 }
  0x10   : > { %s727_s24 = scalar_select %p648_p9, 1, 0 }
  0x11   : > { %s728_s25 = scalar_select %p652_p10, 1, 0 }
  0x12   : > { %p447_p11 = pneg %p648_p9  ;;  %s500_s6 = scalar_lea.vmem %s155_s28, 16 }
  0x13   : > { %p501_p13 = scmp.ne.s32.totalorder %s155_s28, %s500_s6  ;;  %p508_p4 = scmp.lt.s32.totalorder %s155_s28, %s155_s28 }
  0x14   : > { %p666_p12 = pnand %p652_p10, %p447_p11  ;;  %p509_p5 = scmp.lt.s32.totalorder %s500_s6, %s500_s6 }
  0x16   : > { %p502_p0 = pneg %p666_p12  ;;  %p510_p6 = por %p509_p5, %p508_p4 }
  0x18   : > { %p503_p1 = pnand %p502_p0, %p501_p13 }
  0x1a   : > { %p504_p2 = pneg %p503_p1 }
  0x1c   : > { %p511_p8 = pnand %p510_p6, %p504_p2 }
  0x1e   : > { %514 = shalt.err (!%p511_p8)
}
  0x1f   : > { %s578_s7 = smov [#allocation2]   ;;  %s515_s8 = scalar_lea.vmem %s166_s4, 16 }
  0x20   : > { %450 = dma.vmem_to_smem (!%p666_p12), %s155_s28, 16, %s578_s7, [#allocation3]  }
  0x21   : > { %p516_p11 = scmp.ne.s32.totalorder %s166_s4, %s515_s8  ;;  %p523_p9 = scmp.lt.s32.totalorder %s166_s4, %s166_s4 }
  0x22   : > { %p524_p3 = scmp.lt.s32.totalorder %s515_s8, %s515_s8 }
  0x23   : > { %p518_p7 = pnand %p516_p11, %p502_p0 }
  0x24   : > { %p525_p13 = por %p524_p3, %p523_p9 }
  0x25   : > { %p519_p10 = pneg %p518_p7 }
  0x27   : > { %p526_p1 = pnand %p525_p13, %p519_p10 }
  0x29   : > { %529 = shalt.err (!%p526_p1)
}
  0x2a   : > { %s579_s9 = smov [#allocation4]   ;;  %p427_p2 = scmp.ge.s32.totalorder %s576_s16, 5 }
  0x2b   : > { %453 = dma.vmem_to_smem (!%p666_p12), %s166_s4, 16, %s579_s9, [#allocation5]  }
  0x2c   : > { %172 = sbr.rel (%p427_p2) target bundleno = 54 (0x36), region = 24  ;;  %p730_p4 = scmp.ne.s32.totalorder (!%p427_p2), %s725_s20, 0 }
  0x31   : > { %175 = sbr.rel (!%p730_p4) target bundleno = 54 (0x36), region = 28  ;;  %s177_s10 = sand.u32 (%p730_p4), 1, %s564_s13  }
  0x32   : > { %s429_s11 = sshll.u32 (%p730_p4), %s572_s15, 1  ;;  %s428_s17 = sshll.u32 (%p730_p4), %s177_s10, 2 }
  0x33   : > { %s185_s26 = scalar_lea.vmem (%p730_p4), %s720_s2, %s429_s11  ;;  %s179_s27 = scalar_lea.vmem (%p730_p4), [#allocation6], %s428_s17 }
  0x34   : > { %v202_v0 = vld [vmem:[%s185_s26] sm:$0x3] (%p730_p4)  ;;  %v204_v1 = vld [vmem:[%s185_s26 + $0xa] sm:$0x3] (%p730_p4) }
  0x35   : > { %203 = vst [vmem:[%s179_s27] sm:$0x3] (%p730_p4), %v202_v0  ;;  %205 = vst [vmem:[%s179_s27 + $0x2] sm:$0x3] (%p730_p4), %v204_v1 }
  0x36 PF: > { %p731_p3 = scmp.ne.s32.totalorder %s727_s24, 0 }
  0x37   : > { %p732_p7 = scmp.ne.s32.totalorder (!%p731_p3), %s728_s25, 0 }
  0x38   : > { %228 = sbr.rel (%p731_p3) target bundleno = 88 (0x58), region = 62 }
  0x3d   : > { %551 = dma.done.wait (%p732_p7), [#allocation3], 16  }
  0x3e   : > { %553 = vsyncadd (%p732_p7), [#allocation3], 4294967280 }
  0x3f   : > { %555 = dma.done.wait (%p732_p7), [#allocation5], 16  }
  0x40   : > { %557 = vsyncadd (%p732_p7), [#allocation5], 4294967280  ;;  %s239_s20 = sand.u32 1, %s560_s12  }
  0x41   : > { %s433_s28 = sshll.u32 %s239_s20, 2 }
  0x42   : > { %s241_s29 = scalar_lea.vmem [#allocation6], %s433_s28 }
  0x43   : > { %245 = sfence }
  0x44   : > { %s264_s24 = sld [smem:[#allocation2 + %s568_s14]]  ;;  %v266_v2 = vld [vmem:[%s241_s29] sm:$0x3]  ;;  %v267_v3 = vld [vmem:[%s241_s29 + $0x2] sm:$0x3]  ;;  %s261_s4 = scalar_lea.vmem [#allocation7], %s433_s28 }
  0x45   : > { %s265_s30 = sld [smem:[#allocation4 + %s568_s14]]  ;;  %p733_p9 = scmp.ne.s32.totalorder %s726_s22, 0 }
  0x46   : > { %s436_s12 = sshll.u32 (%p733_p9), %s568_s14, 1 }
  0x47   : > { %s288_s6 = scalar_lea.vmem (%p733_p9), %s721_s3, %s436_s12 }
  0x4a   : > { %v268_v4 = vstv %s264_s24 }
  0x4b   : > { %v269_v5 = vmul.f32 %v268_v4, %v266_v2  ;;  %v271_v6 = vstv %s265_s30  ;;  %v270_v7 = vmul.f32 %v268_v4, %v267_v3  ;;  %282 = sbr.rel (!%p733_p9) target bundleno = 88 (0x58), region = 78 }
  0x4d   : > { %v272_v8 = vadd.f32 %v271_v6, %v269_v5  ;;  %v273_v9 = vadd.f32 %v271_v6, %v270_v7 }
  0x4f   : > { %274 = vst [vmem:[%s261_s4] sm:$0x3] %v272_v8  ;;  %275 = vst [vmem:[%s261_s4 + $0x2] sm:$0x3] %v273_v9 }
  0x56   : > { %v305_v10 = vld [vmem:[%s261_s4] sm:$0x3]  ;;  %v307_v11 = vld [vmem:[%s261_s4 + $0x2] sm:$0x3] }
  0x57   : > { %306 = vst [vmem:[%s288_s6] sm:$0x3] %v305_v10  ;;  %308 = vst [vmem:[%s288_s6 + $0xa] sm:$0x3] %v307_v11 }
  0x58 PF: > { %s15_s16 = sadd.s32 1, %s576_s16   ;;  %s734_s12 = smov %s564_s13 }
  0x59   : > { %p12_p10 = scmp.ge.s32.totalorder %s15_s16, 7   ;;  %s735_s13 = smov %s646_s23 }
  0x5a   : > { %s736_s14 = smov %s572_s15  ;;  %s737_s15 = smov %s739_s18 }
  0x5b   :  { %14 = sbr.rel (!%p12_p10) target bundleno = 4 (0x4), region = 144 }
  0x60   :  { %338 = vsyncpa [#allocation3], 1 }
  0x61   :  { %340 = vsyncpa [#allocation3 + $0x1], 1 }
  0x62   :  { %341 = vsyncpa [#allocation5], 1 }

// kernel: batchnorm2d.2
= control target key start
LH: loop header
LB: loop body
LE: loop exit
PB: predicated region body
PF: predicated region fallthrough
CT: control target
= control target key end

     0   :  { %s502_s9 = smov 0   ;;  %s504_s10 = smov 0   ;;  %s581_s0 = inlined_call_operand.vmem [shape: f32[2,5,2,128], index: 0, kind: input, shape index: {}]   ;;  %s582_s1 = inlined_call_operand.vmem [shape: f32[1,5,1,128], index: 1, kind: output, shape index: {0}]   ;;  %s583_s2 = inlined_call_operand.vmem [shape: f32[1,5,1,128], index: 2, kind: output, shape index: {1}]  }
   0x1   :  { %s506_s11 = smov 0   ;;  %s508_s12 = smov 0  }
   0x2   :  { %s510_s13 = smov 0  }
   0x3 LB: > { %s28_s14 = sadd.s32 1, %s480_s12  ;;  %p50_p1 = scmp.ne.s32.totalorder %s472_s10, %s468_s9  ;;  %s484_s13 = sphi %s510_s13, %s13_s13   ;;  %s480_s12 = sphi %s508_s12, %s587_s12   ;;  %s476_s11 = sphi %s506_s11, %s586_s11   ;;  %s472_s10 = sphi %s504_s10, %s585_s10   ;;  %s468_s9 = sphi %s502_s9, %s584_s9  }
   0x4   : > { %p30_p0 = scmp.ge.s32.totalorder %s28_s14, 5  ;;  %p51_p2 = scmp.eq.s32.totalorder %s484_s13, 0 }
   0x5   : > { %s43_s16 = sadd.s32 1, %s472_s10  ;;  %p398_p5 = scmp.ge.s32.totalorder %s484_s13, 5 }
   0x6   : > { %s589_s14 = smov (%p30_p0, %s28_s14), 0  ;;  %p52_p3 = por %p51_p2, %p50_p1 }
   0x7   : > { %s37_s15 = ssub.s32 %s480_s12, %s589_s14  ;;  %132 = sbr.rel (%p398_p5) target bundleno = 17 (0x11), region = 16 }
   0x8   : > { %p41_p4 = scmp.eq.s32.totalorder %s37_s15, 0 }
   0xa   : > { %s537_s17 = scalar_select %p41_p4, %s472_s10, %s43_s16  }
   0xc   : > { %135 = sbr.rel (!%p52_p3) target bundleno = 17 (0x11), region = 20  ;;  %s137_s18 = sand.u32 (%p52_p3), 1, %s472_s10  }
   0xd   : > { %s400_s19 = sshll.u32 (%p52_p3), %s480_s12, 1  ;;  %s399_s20 = sshll.u32 (%p52_p3), %s137_s18, 2 }
   0xe   : > { %s145_s23 = scalar_lea.vmem (%p52_p3), %s581_s0, %s400_s19  ;;  %s139_s24 = scalar_lea.vmem (%p52_p3), [#allocation2], %s399_s20 }
   0xf   : > { %v162_v0 = vld [vmem:[%s145_s23] sm:$0x3] (%p52_p3)  ;;  %v164_v1 = vld [vmem:[%s145_s23 + $0xa] sm:$0x3] (%p52_p3) }
  0x10   : > { %163 = vst [vmem:[%s139_s24] sm:$0x3] (%p52_p3), %v162_v0  ;;  %165 = vst [vmem:[%s139_s24 + $0x2] sm:$0x3] (%p52_p3), %v164_v1 }
  0x11 PF: > { %p401_p6 = scmp.ge.s32.totalorder %s484_s13, 1  ;;  %p184_p7 = scmp.lt.s32.totalorder %s484_s13, 6 }
  0x13   : > { %p185_p8 = pnand %p401_p6, %p184_p7 }
  0x14   : > { %p224_p9 = scmp.lt.s32.totalorder (!%p185_p8), %s476_s11, 4  ;;  %s191_s25 = sand.u32 (!%p185_p8), 1, %s468_s9  }
  0x15   : > { %188 = sbr.rel (%p185_p8) target bundleno = 48 (0x30), region = 54  ;;  %s402_s26 = sshll.u32 (!%p185_p8), %s191_s25, 2 }
  0x16   : > { %s193_s5 = scalar_lea.vmem (!%p185_p8), [#allocation2], %s402_s26 }
  0x1a   : > { %s591_s11 = smov (!%p224_p9, %s476_s11), 4  ;;  %vm245_vm0 = vcmask 1041408   ;;  %v242_v2 = vld [vmem:[%s193_s5] sm:$0x3]  ;;  %v243_v3 = vld [vmem:[%s193_s5 + $0x2] sm:$0x3] }
  0x1b   : > { %s553_s29 = scalar_lea.vmem %s582_s1, %s591_s11  ;;  %s558_s4 = scalar_lea.vmem %s583_s2, %s591_s11  ;;  %v486_v4 = vmov 0.0   ;;  %v246_v5 = vsel %vm245_vm0, %v242_v2, 0.0  ;;  %v247_v6 = vsel %vm245_vm0, %v243_v3, 0.0  ;;  %v258_v7 = vmul.f32 %v242_v2, %v242_v2 }
  0x1c   : > { %240 = vst [vmem:[%s553_s29] sm:$0x1] %v486_v4  ;;  %241 = vst [vmem:[%s558_s4] sm:$0x1] %v486_v4  ;;  %v259_v8 = vmul.f32 %v243_v3, %v243_v3  ;;  %v248_v9 = vadd.f32 %v247_v6, %v246_v5 }
  0x1d   : > { %v260_v10 = vsel %vm245_vm0, %v258_v7, 0.0 }
  0x1e   : > { %v261_v11 = vsel %vm245_vm0, %v259_v8, 0.0  ;;  %v249_v12 = vrot.slane %v248_v9, 4 }
  0x1f   : > { %v262_v13 = vadd.f32 %v261_v11, %v260_v10 }
  0x20   : > { %v250_v14 = vadd.f32 %v249_v12, %v248_v9 }
  0x21   : > { %v263_v15 = vrot.slane %v262_v13, 4 }
  0x22   : > { %v251_v16 = vrot.slane %v250_v14, 2 }
  0x23   : > { %v264_v17 = vadd.f32 %v263_v15, %v262_v13  ;;  %v244_v22 = vld [vmem:[%s553_s29] sm:$0x1] }
  0x24   : > { %v252_v18 = vadd.f32 %v251_v16, %v250_v14  ;;  %v257_v25 = vld [vmem:[%s558_s4] sm:$0x1] }
  0x25   : > { %v265_v19 = vrot.slane %v264_v17, 2 }
  0x26   : > { %v253_v20 = vrot.slane %v252_v18, 1 }
  0x27   : > { %v266_v21 = vadd.f32 %v265_v19, %v264_v17 }
  0x28   : > { %v254_v23 = vadd.f32 %v253_v20, %v252_v18 }
  0x29   : > { %v267_v24 = vrot.slane %v266_v21, 1 }
  0x2a   : > { %v255_v26 = vadd.f32 %v254_v23, %v244_v22 }
  0x2b   : > { %v268_v27 = vadd.f32 %v267_v24, %v266_v21 }
  0x2c   : > { %256 = vst [vmem:[%s553_s29] sm:$0x1] %v255_v26 }
  0x2d   : > { %v269_v28 = vadd.f32 %v268_v27, %v257_v25 }
  0x2f   : > { %270 = vst [vmem:[%s558_s4] sm:$0x1] %v269_v28 }
  0x30 PF: > { %s13_s13 = sadd.s32 1, %s484_s13   ;;  %s584_s9 = smov %s472_s10 }
  0x31   : > { %p10_p10 = scmp.ge.s32.totalorder %s13_s13, 7   ;;  %s585_s10 = smov %s537_s17 }
  0x32   : > { %s586_s11 = smov %s480_s12  ;;  %s587_s12 = smov %s589_s14 }
  0x33   :  { %12 = sbr.rel (!%p10_p10) target bundleno = 3 (0x3), region = 109 }

</bundles_post_ra>
